<compile_context>
chip_gen: v7x
topology: tpu7x:2x2x1
jax: 0.10.0
libtpu: 0.0.40
codegen_flags: <defaults>
</compile_context>

<pallas_src>
import jax
import jax.numpy as jnp
from jax.experimental import pallas as pl
from jax.experimental.pallas import tpu as pltpu

EPS = 1e-5


def bn_relu_kernel(x_ref, gamma_ref, beta_ref, o_ref):
    # x_ref: (L, tc) f32, channels on lanes; gamma/beta: (1, tc)
    x = x_ref[...]
    inv_n = 1.0 / x.shape[0]

    # One pass over x for both reductions (per-lane, i.e. per-channel).
    s = jnp.sum(x, axis=0, keepdims=True)            # (1, tc)
    sq = jnp.sum(x * x, axis=0, keepdims=True)       # (1, tc)
    mean = s * inv_n
    var = jnp.maximum(sq * inv_n - mean * mean, 0.0)  # biased var, clamped

    # Fold affine into per-channel scale/bias: y = x*scale + bias
    scale = gamma_ref[...] * jax.lax.rsqrt(var + EPS)  # (1, tc)
    bias = beta_ref[...] - mean * scale                # (1, tc)

    o_ref[...] = jnp.maximum(x * scale + bias, 0.0)


def batchnorm_relu(x_nchw, gamma, beta, *, tc=128):
    """x_nchw: (N, C, H, W) float32; gamma/beta: (C,) float32."""
    N, C, H, W = x_nchw.shape
    L = N * H * W

    # NCHW -> (L, C): channels land on the lane axis (lane-dense).
    x2d = jnp.transpose(x_nchw, (0, 2, 3, 1)).reshape(L, C)
    g2d = gamma.reshape(1, C)
    b2d = beta.reshape(1, C)

    grid = (pl.cdiv(C, tc),)  # partial last block handled by Pallas masking

    out2d = pl.pallas_call(
        bn_relu_kernel,
        out_shape=jax.ShapeDtypeStruct((L, C), jnp.float32),
        grid_spec=pltpu.PrefetchScalarGridSpec(
            num_scalar_prefetch=0,
            grid=grid,
            in_specs=[
                pl.BlockSpec((L, tc), lambda c: (0, c)),
                pl.BlockSpec((1, tc), lambda c: (0, c)),
                pl.BlockSpec((1, tc), lambda c: (0, c)),
            ],
            out_specs=pl.BlockSpec((L, tc), lambda c: (0, c)),
        ),
        compiler_params=pltpu.CompilerParams(
            # per-channel stats are block-local -> channel tiles are independent
            dimension_semantics=("parallel",),
        ),
    )(x2d, g2d, b2d)

    # (L, C) -> (N, C, H, W)
    return jnp.transpose(out2d.reshape(N, H, W, C), (0, 3, 1, 2))


def reference(x_nchw, gamma, beta):
    mean = jnp.mean(x_nchw, axis=(0, 2, 3), keepdims=True)
    var = jnp.mean((x_nchw - mean) ** 2, axis=(0, 2, 3), keepdims=True)
    y = (x_nchw - mean) * jax.lax.rsqrt(var + EPS)
    y = y * gamma.reshape(1, -1, 1, 1) + beta.reshape(1, -1, 1, 1)
    return jnp.maximum(y, 0.0)


if __name__ == "__main__":
    key = jax.random.PRNGKey(0)
    kx, kg, kb = jax.random.split(key, 3)

    N, C, H, W = 1, 440, 7, 7  # matches BatchNorm2d(440) and the module's input
    x = jax.random.normal(kx, (N, C, H, W), dtype=jnp.float32)
    gamma = 1.0 + 0.1 * jax.random.normal(kg, (C,), dtype=jnp.float32)
    beta = 0.1 * jax.random.normal(kb, (C,), dtype=jnp.float32)

    out = batchnorm_relu(x, gamma, beta)
    out = jax.block_until_ready(out)

    ref = reference(x, gamma, beta)
    assert out.shape == (N, C, H, W)
    assert jnp.allclose(out, ref, atol=1e-5, rtol=1e-5), "mismatch vs reference"

    print("KERNEL_OK")
</pallas_src>

<mosaic_0001>
module attributes {stable_mosaic.version = 11 : i64} {
  func.func @bn_relu_kernel(%arg0: i32, %arg1: memref<49x128xf32, #tpu.memory_space<vmem>>, %arg2: memref<1x128xf32, #tpu.memory_space<vmem>>, %arg3: memref<1x128xf32, #tpu.memory_space<vmem>>, %arg4: memref<49x128xf32, #tpu.memory_space<vmem>>) attributes {dimension_semantics = [#tpu.dimension_semantics<parallel>], iteration_bounds = array<i64: 4>, scalar_prefetch = 0 : i64, scratch_operands = 0 : i64, tpu.core_type = #tpu.core_type<tc>, window_params = [{transform_indices = @transform_0, window_bounds = array<i64: 49, 128>}, {transform_indices = @transform_1, window_bounds = array<i64: 1, 128>}, {transform_indices = @transform_2, window_bounds = array<i64: 1, 128>}, {transform_indices = @transform_3, window_bounds = array<i64: 49, 128>}]} {
    %c0 = arith.constant 0 : index
    %c0_0 = arith.constant 0 : index
    %0 = vector.load %arg1[%c0, %c0_0] : memref<49x128xf32, #tpu.memory_space<vmem>>, vector<49x128xf32>
    %cst = arith.constant dense<0.000000e+00> : vector<128xf32>
    %1 = vector.multi_reduction <add>, %0, %cst [0] : vector<49x128xf32> to vector<128xf32>
    %2 = vector.shape_cast %1 : vector<128xf32> to vector<1x128xf32>
    %3 = arith.mulf %0, %0 : vector<49x128xf32>
    %cst_1 = arith.constant dense<0.000000e+00> : vector<128xf32>
    %4 = vector.multi_reduction <add>, %3, %cst_1 [0] : vector<49x128xf32> to vector<128xf32>
    %5 = vector.shape_cast %4 : vector<128xf32> to vector<1x128xf32>
    %cst_2 = arith.constant 0.0204081628 : f32
    %6 = vector.broadcast %cst_2 : f32 to vector<1x128xf32>
    %7 = arith.mulf %2, %6 : vector<1x128xf32>
    %cst_3 = arith.constant 0.0204081628 : f32
    %8 = vector.broadcast %cst_3 : f32 to vector<1x128xf32>
    %9 = arith.mulf %5, %8 : vector<1x128xf32>
    %10 = arith.mulf %7, %7 : vector<1x128xf32>
    %11 = arith.subf %9, %10 : vector<1x128xf32>
    %cst_4 = arith.constant 0.000000e+00 : f32
    %12 = vector.broadcast %cst_4 : f32 to vector<1x128xf32>
    %13 = arith.maximumf %11, %12 : vector<1x128xf32>
    %c0_5 = arith.constant 0 : index
    %c0_6 = arith.constant 0 : index
    %14 = vector.load %arg2[%c0_5, %c0_6] : memref<1x128xf32, #tpu.memory_space<vmem>>, vector<1x128xf32>
    %cst_7 = arith.constant 9.99999974E-6 : f32
    %15 = vector.broadcast %cst_7 : f32 to vector<1x128xf32>
    %16 = arith.addf %13, %15 : vector<1x128xf32>
    %17 = math.rsqrt %16 : vector<1x128xf32>
    %18 = arith.mulf %14, %17 : vector<1x128xf32>
    %c0_8 = arith.constant 0 : index
    %c0_9 = arith.constant 0 : index
    %19 = vector.load %arg3[%c0_8, %c0_9] : memref<1x128xf32, #tpu.memory_space<vmem>>, vector<1x128xf32>
    %20 = arith.mulf %7, %18 : vector<1x128xf32>
    %21 = arith.subf %19, %20 : vector<1x128xf32>
    %22 = vector.broadcast %18 : vector<1x128xf32> to vector<49x128xf32>
    %23 = arith.mulf %0, %22 : vector<49x128xf32>
    %24 = vector.broadcast %21 : vector<1x128xf32> to vector<49x128xf32>
    %25 = arith.addf %23, %24 : vector<49x128xf32>
    %cst_10 = arith.constant 0.000000e+00 : f32
    %26 = vector.broadcast %cst_10 : f32 to vector<49x128xf32>
    %27 = arith.maximumf %25, %26 : vector<49x128xf32>
    %c0_11 = arith.constant 0 : index
    %c0_12 = arith.constant 0 : index
    %28 = vector.load %arg4[%c0_11, %c0_12] : memref<49x128xf32, #tpu.memory_space<vmem>>, vector<49x128xf32>
    tpu.vector_store %arg4[%c0_11, %c0_12], %27 {strides = array<i32>} : memref<49x128xf32, #tpu.memory_space<vmem>>, vector<49x128xf32>,
    return
  }
  func.func @transform_0(%arg0: i32) -> (i32, i32) {
    %c0_i32 = arith.constant 0 : i32
    %c0_i32_0 = arith.constant 0 : i32
    return %c0_i32, %arg0 : i32, i32
  }
  func.func @transform_1(%arg0: i32) -> (i32, i32) {
    %c0_i32 = arith.constant 0 : i32
    %c0_i32_0 = arith.constant 0 : i32
    return %c0_i32, %arg0 : i32, i32
  }
  func.func @transform_2(%arg0: i32) -> (i32, i32) {
    %c0_i32 = arith.constant 0 : i32
    %c0_i32_0 = arith.constant 0 : i32
    return %c0_i32, %arg0 : i32, i32
  }
  func.func @transform_3(%arg0: i32) -> (i32, i32) {
    %c0_i32 = arith.constant 0 : i32
    %c0_i32_0 = arith.constant 0 : i32
    return %c0_i32, %arg0 : i32, i32
  }
}

</mosaic_0001>

<bundles_post_ra>
// kernel: tpu_custom_call.1
= control target key start
LH: loop header
LB: loop body
LE: loop exit
PB: predicated region body
PF: predicated region fallthrough
CT: control target
= control target key end

     0   :  { %8 = vsyncpa [#allocation3], 0  ;;  %s884_s0 = inlined_call_operand.hbm [shape: f32[49,440], index: 0, kind: input, shape index: {}]   ;;  %s885_s1 = inlined_call_operand.hbm [shape: f32[1,440], index: 1, kind: input, shape index: {}]   ;;  %s886_s2 = inlined_call_operand.vmem [shape: f32[1,440], index: 2, kind: input, shape index: {}]   ;;  %s887_s3 = inlined_call_operand.hbm [shape: f32[49,440], index: 3, kind: output, shape index: {}]  }
   0x1   :  { %10 = vsyncpa [#allocation3 + $0x1], 0 }
   0x2   :  { %11 = vsyncpa [#allocation6], 0 }
   0x3   :  { %13 = vsyncpa [#allocation6 + $0x1], 0 }
   0x4   :  { %14 = vsyncpa [#allocation4], 0 }
   0x5   :  { %16 = vsyncpa [#allocation4 + $0x1], 0  ;;  %s675_s12 = smov 0   ;;  %s677_s13 = smov 0  }
   0x6   :  { %s679_s14 = smov 0   ;;  %s681_s15 = smov 0  }
   0x7 LB: > { %s696_s16 = sadd.s32 4294967295, %s644_s15   ;;  %s444_s17 = sadd.s32 4294967294, %s644_s15   ;;  %s644_s15 = sphi %s681_s15, %s903_s15   ;;  %s640_s14 = sphi %s679_s14, %s902_s14   ;;  %s636_s13 = sphi %s677_s13, %s901_s13   ;;  %s632_s12 = sphi %s675_s12, %s900_s12  }
   0x8   : > { %s700_s18 = sadd.s32 1, %s644_s15   ;;  %s29_s19 = sadd.s32 1, %s640_s14 }
   0x9   : > { %s26_s20 = ssub.s32 %s644_s15, %s700_s18  ;;  %p36_p0 = scmp.ne.s32.totalorder %s640_s14, %s636_s13 }
   0xa   : > { %p27_p1 = scmp.eq.s32.totalorder %s26_s20, 0  ;;  %p37_p2 = scmp.eq.s32.totalorder %s644_s15, 0 }
   0xb   : > { %p42_p3 = scmp.ne.s32.totalorder %s636_s13, %s632_s12  ;;  %p43_p4 = scmp.eq.s32.totalorder %s696_s16, 0 }
   0xc   : > { %s712_s21 = scalar_select %p27_p1, %s640_s14, %s29_s19  }
   0xd   : > { %p38_p5 = por %p37_p2, %p36_p0  ;;  %p714_p6 = por %p43_p4, %p42_p3 }
   0xe   : > { %p118_p7 = scmp.eq.s32.totalorder %s696_s16, 3  ;;  %p124_p8 = scmp.eq.s32.totalorder %s444_s17, 3 }
   0xf   : > { %s890_s22 = scalar_select %p714_p6, 1, 0 }
  0x10   : > { %p472_p9 = scmp.lt.s32.totalorder %s644_s15, 4  ;;  %p720_p10 = por %p118_p7, %p36_p0 }
  0x11   : > { %p724_p11 = por %p124_p8, %p42_p3  ;;  %s729_s25 = sand.u32 1, %s640_s14  }
  0x12   : > { %s891_s23 = scalar_select %p720_p10, 1, 0 }
  0x13   : > { %s892_s24 = scalar_select %p724_p11, 1, 0 }
  0x14   : > { %s447_s26 = sshll.u32 %s644_s15, 7  ;;  %s453_s27 = smul.u32 56, %s729_s25 }
  0x15   : > { %s736_s30 = scalar_lea.hbm %s884_s0, %s447_s26  ;;  %p738_p12 = pnand %p472_p9, %p38_p5 }
  0x16   : > { %s148_s5 = scalar_lea.vmem [#allocation2], %s453_s27  ;;  %s145_s7 = scalar_lea.sflag [#allocation3], %s729_s25 }
  0x17   : > { %s154_s6 = sshll.u32 %s148_s5, 4  ;;  %s514_s8 = scalar_lea.hbm %s736_s30, 896  ;;  %s742_s6 = int_to_ptr.vmem [resolvable:$true] %s154_s6 }
  0x18   : > { %p515_p0 = scmp.ne.s32.totalorder %s736_s30, %s514_s8  ;;  %p516_p1 = pneg %p738_p12 }
  0x19   : > { %s519_s11 = scalar_lea.hbm %s884_s0, 3584  ;;  %p520_p4 = scmp.lt.u32.totalorder %s736_s30, %s884_s0 }
  0x1a   : > { %p517_p2 = pnand %p516_p1, %p515_p0  ;;  %p521_p5 = scmp.lt.u32.totalorder %s519_s11, %s514_s8 }
  0x1b   : > { %p523_p8 = scmp.lt.u32.totalorder %s514_s8, %s736_s30 }
  0x1c   : > { %p518_p3 = pneg %p517_p2  ;;  %p522_p7 = por %p521_p5, %p520_p4 }
  0x1e   : > { %p524_p9 = por %p523_p8, %p522_p7 }
  0x20   : > { %p525_p13 = pnand %p524_p9, %p518_p3 }
  0x22   : > { %528 = shalt.err (!%p525_p13)
}
  0x23   : > { %s529_s20 = scalar_lea.vmem %s742_s6, 896  ;;  %s646_s26 = smov [#allocation2]  }
  0x24   : > { %p530_p0 = scmp.ne.s32.totalorder %s742_s6, %s529_s20  ;;  %s534_s27 = sshll.u32 %s646_s26, 4  ;;  %s535_s27 = int_to_ptr.vmem [resolvable:$false] %s534_s27 }
  0x25   : > { %s536_s28 = scalar_lea.vmem %s535_s27, 1792  ;;  %p537_p10 = scmp.lt.s32.totalorder %s742_s6, %s535_s27 }
  0x26   : > { %p532_p2 = pnand %p530_p0, %p516_p1  ;;  %p538_p4 = scmp.lt.s32.totalorder %s536_s28, %s529_s20 }
  0x28   : > { %p533_p11 = pneg %p532_p2  ;;  %p539_p5 = por %p538_p4, %p537_p10 }
  0x2a   : > { %p540_p7 = pnand %p539_p5, %p533_p11 }
  0x2c   : > { %543 = shalt.err (!%p540_p7)
}
  0x2d   : > { %s647_s29 = smov 512   ;;  %s648_s5 = smov 128  }
  0x2e   : > { %s649_s8 = smov 8   ;;  %p185_p13 = scmp.lt.s32.totalorder %s644_s15, 5 }
  0x2f   : > { %464 = dma.hbm_to_vmem [thread:$0]  (!%p738_p12), %s736_s30, 896, %s742_s6, %s145_s7, %s647_s29, %s648_s5, %s649_s8  }
  0x30   : > { %s448_s9 = sshll.u32 %s644_s15, 4  ;;  %p894_p10 = scmp.ge.s32.totalorder %s644_s15, 1 }
  0x31   : > { %s784_s19 = scalar_lea.hbm %s885_s1, %s448_s9  ;;  %s167_s20 = scalar_lea.vmem [#allocation5], %s729_s25 }
  0x32   : > { %p777_p11 = pnand %p894_p10, %p185_p13  ;;  %s174_s26 = sshll.u32 %s167_s20, 4  ;;  %s175_s26 = int_to_ptr.vmem [resolvable:$true] %s174_s26 }
  0x33   : > { %s165_s30 = scalar_lea.sflag [#allocation6], %s729_s25  ;;  %s544_s6 = scalar_lea.hbm %s784_s19, 16 }
  0x34   : > { %s895_s10 = scalar_select %p777_p11, 1, 0 }
  0x35   : > { %p545_p3 = scmp.ne.s32.totalorder %s784_s19, %s544_s6  ;;  %s549_s28 = scalar_lea.hbm %s885_s1, 64 }
  0x36   : > { %p550_p0 = scmp.lt.u32.totalorder %s784_s19, %s885_s1  ;;  %p551_p2 = scmp.lt.u32.totalorder %s549_s28, %s544_s6 }
  0x37   : > { %p547_p8 = pnand %p545_p3, %p516_p1  ;;  %p553_p5 = scmp.lt.u32.totalorder %s544_s6, %s784_s19 }
  0x38   : > { %p552_p4 = por %p551_p2, %p550_p0 }
  0x39   : > { %p548_p9 = pneg %p547_p8 }
  0x3a   : > { %p554_p7 = por %p553_p5, %p552_p4 }
  0x3c   : > { %p555_p13 = pnand %p554_p7, %p548_p9 }
  0x3e   : > { %558 = shalt.err (!%p555_p13)
}
  0x3f   : > { %s559_s25 = scalar_lea.vmem %s175_s26, 16  ;;  %s650_s8 = smov [#allocation5]  }
  0x40   : > { %p560_p10 = scmp.ne.s32.totalorder %s175_s26, %s559_s25  ;;  %s564_s9 = sshll.u32 %s650_s8, 4  ;;  %s565_s9 = int_to_ptr.vmem [resolvable:$false] %s564_s9 }
  0x41   : > { %s566_s11 = scalar_lea.vmem %s565_s9, 32  ;;  %p567_p6 = scmp.lt.s32.totalorder %s175_s26, %s565_s9 }
  0x42   : > { %p562_p3 = pnand %p560_p10, %p516_p1  ;;  %p568_p11 = scmp.lt.s32.totalorder %s566_s11, %s559_s25 }
  0x44   : > { %p563_p8 = pneg %p562_p3  ;;  %p569_p0 = por %p568_p11, %p567_p6 }
  0x46   : > { %p570_p2 = pnand %p569_p0, %p563_p8 }
  0x48   : > { %573 = shalt.err (!%p570_p2)
}
  0x49   : > { %467 = dma.hbm_to_vmem [thread:$0]  (!%p738_p12), %s784_s19, 16, %s175_s26, %s165_s30  }
  0x4a   : > { %p896_p9 = scmp.ne.s32.totalorder %s895_s10, 0 }
  0x4b   : > { %s810_s17 = sand.u32 (!%p896_p9), 1, %s636_s13   ;;  %p897_p6 = scmp.ne.s32.totalorder (!%p896_p9), %s890_s22, 0 }
  0x4c   : > { %189 = sbr.rel (%p896_p9) target bundleno = 163 (0xa3), region = 32  ;;  %s192_s6 = scalar_lea.sflag (!%p896_p9), [#allocation3], %s810_s17 }
  0x4d   : > { %s454_s20 = smul.u32 (!%p896_p9), 56, %s810_s17 }
  0x4f   : > { %s195_s7 = scalar_lea.vmem (!%p896_p9), [#allocation2], %s454_s20 }
  0x53   : > { %619 = dma.done.wait (%p897_p6), %s192_s6, 896  }
  0x54   : > { %621 = vsyncadd (%p897_p6), %s192_s6, 4294966400  ;;  %s201_s4 = scalar_lea.sflag [#allocation6], %s810_s17  ;;  %s203_s10 = scalar_lea.vmem [#allocation5], %s810_s17 }
  0x55   : > { %623 = dma.done.wait (%p897_p6), %s201_s4, 16  }
  0x56   : > { %625 = vsyncadd (%p897_p6), %s201_s4, 4294967280  ;;  %v236_v0 = vld [vmem:[%s195_s7] sm:$0xff]  ;;  %v237_v1 = vld [vmem:[%s195_s7 + $0x8] sm:$0xff]  ;;  %vm248_vm0 = vcmask 1040384   ;;  %p233_p12 = scmp.lt.s32.totalorder %s696_s16, 3  ;;  %v290_v46 = vlaneseq  ;;  %s232_s27 = scalar_lea.vmem [#allocation7], %s454_s20 }
  0x57   : > { %v238_v2 = vld [vmem:[%s195_s7 + $0x10] sm:$0xff]  ;;  %v239_v3 = vld [vmem:[%s195_s7 + $0x18] sm:$0xff]  ;;  %v243_v4 = vadd.f32 %v237_v1, %v236_v0  ;;  %v257_v5 = vmul.f32 %v236_v0, %v236_v0  ;;  %v258_v6 = vmul.f32 %v237_v1, %v237_v1  ;;  %v240_v8 = vld [vmem:[%s195_s7 + $0x20] sm:$0xff]  ;;  %s342_s28 = sshll.u32 %s232_s27, 4  ;;  %s450_s29 = sshll.u32 %s696_s16, 7  ;;  %s836_s28 = int_to_ptr.vmem [resolvable:$true] %s342_s28 }
  0x58   : > { %v259_v7 = vmul.f32 %v238_v2, %v238_v2  ;;  %v242_v9 = vld [vmem:[%s195_s7 + $0x30] sm:$0x1]  ;;  %v260_v11 = vmul.f32 %v239_v3, %v239_v3  ;;  %v241_v13 = vld [vmem:[%s195_s7 + $0x28] sm:$0xff]  ;;  %v261_v15 = vmul.f32 %v240_v8, %v240_v8  ;;  %s234_s22 = scalar_select %p233_p12, %s696_s16, 3  ;;  %v291_v47 = vshrl.u32 %v290_v46, 7 }
  0x59   : > { %v244_v10 = vadd.f32 %v243_v4, %v238_v2  ;;  %v264_v12 = vadd.f32 %v258_v6, %v257_v5  ;;  %v263_v17 = vmul.f32 %v242_v9, %v242_v9  ;;  %v262_v19 = vmul.f32 %v241_v13, %v241_v13  ;;  %v282_v48 = vld [vmem:[%s203_s10] sm:$0x1]  ;;  %s841_s16 = scalar_lea.hbm %s887_s3, %s450_s29  ;;  %s330_s8 = scalar_lea.sflag [#allocation4], %s810_s17 }
  0x5a   : > { %v249_v21 = vsel %vm248_vm0, %v242_v9, 0.0  ;;  %s235_s30 = scalar_lea.vmem %s886_s2, %s234_s22  ;;  %v292_v49 = vsub.s32 0, %v291_v47  ;;  %s574_s9 = scalar_lea.vmem %s836_s28, 896 }
  0x5b   : > { %v245_v14 = vadd.f32 %v244_v10, %v239_v3  ;;  %v265_v16 = vadd.f32 %v264_v12, %v259_v7  ;;  %v269_v24 = vsel %vm248_vm0, %v263_v17, 0.0  ;;  %v286_v52 = vld [vmem:[%s235_s30] sm:$0x1]  ;;  %p575_p1 = scmp.ne.s32.totalorder %s836_s28, %s574_s9  ;;  %p898_p11 = scmp.ne.s32.totalorder %s891_s23, 0 }
  0x5c   : > { %s651_s11 = smov [#allocation7]  }
  0x5d   : > { %v246_v18 = vadd.f32 %v245_v14, %v240_v8  ;;  %v266_v20 = vadd.f32 %v265_v16, %v260_v11  ;;  %p576_p4 = pnand %p575_p1, %p898_p11  ;;  %s578_s20 = sshll.u32 %s651_s11, 4  ;;  %s579_s20 = int_to_ptr.vmem [resolvable:$false] %s578_s20 }
  0x5e   : > { %s580_s6 = scalar_lea.vmem %s579_s20, 1792  ;;  %p581_p7 = scmp.lt.s32.totalorder %s836_s28, %s579_s20 }
  0x5f   : > { %v247_v22 = vadd.f32 %v246_v18, %v241_v13  ;;  %v267_v23 = vadd.f32 %v266_v20, %v261_v15  ;;  %p577_p5 = pneg %p576_p4  ;;  %p582_p13 = scmp.lt.s32.totalorder %s580_s6, %s574_s9 }
  0x61   : > { %v250_v25 = vadd.f32 %v249_v21, %v247_v22  ;;  %v268_v26 = vadd.f32 %v267_v23, %v262_v19  ;;  %p583_p10 = por %p582_p13, %p581_p7 }
  0x63   : > { %v251_v27 = vrot.slane %v250_v25, 4  ;;  %v270_v28 = vadd.f32 %v269_v24, %v268_v26  ;;  %p584_p3 = pnand %p583_p10, %p577_p5 }
  0x65   : > { %v252_v29 = vadd.f32 %v251_v27, %v250_v25  ;;  %v271_v30 = vrot.slane %v270_v28, 4 }
  0x67   : > { %v253_v31 = vrot.slane %v252_v29, 2  ;;  %v272_v32 = vadd.f32 %v271_v30, %v270_v28 }
  0x69   : > { %v254_v33 = vadd.f32 %v253_v31, %v252_v29  ;;  %v273_v34 = vrot.slane %v272_v32, 2 }
  0x6b   : > { %v255_v35 = vrot.slane %v254_v33, 1  ;;  %v274_v36 = vadd.f32 %v273_v34, %v272_v32 }
  0x6d   : > { %v256_v37 = vadd.f32 %v255_v35, %v254_v33  ;;  %v275_v38 = vrot.slane %v274_v36, 1 }
  0x6f   : > { %v276_v39 = vadd.f32 %v275_v38, %v274_v36  ;;  %v277_v40 = vmul.f32 0.020408163, %v256_v37 }
  0x71   : > { %v278_v41 = vmul.f32 0.020408163, %v276_v39  ;;  %v279_v42 = vmul.f32 %v277_v40, %v277_v40 }
  0x73   : > { %v280_v43 = vsub.f32 %v278_v41, %v279_v42 }
  0x75   : > { %v281_v44 = vmax.f32 %v280_v43, 0.0 }
  0x77   : > { %v283_v45 = vadd.f32 1e-05, %v281_v44 }
  0x79   : > { %512 = vrsqrt.f32 %v283_v45 }
  0x83   : > { %v513_v50 = vpop.eup %512 }
  0x84   : > { %v285_v51 = vmul.f32 %v513_v50, %v282_v48 }
  0x86   : > { %v287_v53 = vmul.f32 %v285_v51, %v277_v40  ;;  %v293_v54 = vrot.slane %v285_v51, %v292_v49 }
  0x88   : > { %v288_v55 = vsub.f32 %v286_v52, %v287_v53  ;;  %v295_v56 = vmul.f32 %v293_v54, %v236_v0  ;;  %v296_v57 = vmul.f32 %v293_v54, %v237_v1  ;;  %v297_v58 = vmul.f32 %v293_v54, %v238_v2 }
  0x89   : > { %v298_v59 = vmul.f32 %v293_v54, %v239_v3  ;;  %v299_v60 = vmul.f32 %v293_v54, %v240_v8  ;;  %v300_v61 = vmul.f32 %v293_v54, %v241_v13  ;;  %v301_v62 = vmul.f32 %v293_v54, %v242_v9 }
  0x8a   : > { %v306_v63 = vrot.slane %v288_v55, %v292_v49 }
  0x8c   : > { %v308_v4 = vadd.f32 %v306_v63, %v295_v56  ;;  %v309_v5 = vadd.f32 %v306_v63, %v296_v57  ;;  %v310_v6 = vadd.f32 %v306_v63, %v297_v58  ;;  %v311_v7 = vadd.f32 %v306_v63, %v298_v59 }
  0x8d   : > { %v312_v10 = vadd.f32 %v306_v63, %v299_v60  ;;  %v313_v11 = vadd.f32 %v306_v63, %v300_v61  ;;  %v314_v0 = vadd.f32 %v306_v63, %v301_v62 }
  0x8e   : > { %v315_v1 = vmax.f32 %v308_v4, 0.0  ;;  %v316_v2 = vmax.f32 %v309_v5, 0.0  ;;  %v317_v3 = vmax.f32 %v310_v6, 0.0  ;;  %v318_v8 = vmax.f32 %v311_v7, 0.0 }
  0x8f   : > { %v319_v9 = vmax.f32 %v312_v10, 0.0  ;;  %v320_v12 = vmax.f32 %v313_v11, 0.0  ;;  %v321_v13 = vmax.f32 %v314_v0, 0.0 }
  0x90   : > { %322 = vst [vmem:[%s232_s27] sm:$0xff] %v315_v1  ;;  %323 = vst [vmem:[%s232_s27 + $0x8] sm:$0xff] %v316_v2 }
  0x91   : > { %324 = vst [vmem:[%s232_s27 + $0x10] sm:$0xff] %v317_v3  ;;  %325 = vst [vmem:[%s232_s27 + $0x18] sm:$0xff] %v318_v8 }
  0x92   : > { %326 = vst [vmem:[%s232_s27 + $0x20] sm:$0xff] %v319_v9  ;;  %327 = vst [vmem:[%s232_s27 + $0x28] sm:$0xff] %v320_v12 }
  0x93   : > { %328 = vst [vmem:[%s232_s27 + $0x30] sm:$0x1] %v321_v13 }
  0x94   : > { %587 = shalt.err (!%p584_p3)
}
  0x95   : > { %s588_s7 = scalar_lea.hbm %s841_s16, 896  ;;  %s592_s22 = scalar_lea.hbm %s887_s3, 3584 }
  0x96   : > { %p589_p8 = scmp.ne.s32.totalorder %s841_s16, %s588_s7  ;;  %p593_p9 = scmp.lt.u32.totalorder %s841_s16, %s887_s3 }
  0x97   : > { %p594_p6 = scmp.lt.u32.totalorder %s592_s22, %s588_s7  ;;  %p596_p1 = scmp.lt.u32.totalorder %s588_s7, %s841_s16 }
  0x98   : > { %p590_p0 = pnand %p589_p8, %p898_p11 }
  0x99   : > { %p595_p12 = por %p594_p6, %p593_p9 }
  0x9a   : > { %p591_p2 = pneg %p590_p0 }
  0x9b   : > { %p597_p4 = por %p596_p1, %p595_p12 }
  0x9d   : > { %p598_p5 = pnand %p597_p4, %p591_p2 }
  0x9f   : > { %601 = shalt.err (!%p598_p5)
}
  0xa0   : > { %s652_s30 = smov 128   ;;  %s653_s27 = smov 512  }
  0xa1   : > { %s654_s29 = smov 8  }
  0xa2   : > { %459 = dma.vmem_to_hbm [thread:$0]  (%p898_p11), %s836_s28, 896, %s841_s16, %s330_s8, %s652_s30, %s653_s27, %s654_s29  }
  0xa3 PF: > { %p473_p7 = scmp.ge.s32.totalorder %s644_s15, 2  ;;  %s357_s5 = sand.u32 1, %s632_s12  }
  0xa4   : > { %p899_p13 = scmp.ne.s32.totalorder %s892_s24, 0  ;;  %s358_s25 = scalar_lea.sflag [#allocation4], %s357_s5 }
  0xa6   : > { %p469_p10 = pnand %p473_p7, %p899_p13 }
  0xa8   : > { %627 = dma.done.wait (!%p469_p10), %s358_s25, 896  }
  0xa9   : > { %629 = vsyncadd (!%p469_p10), %s358_s25, 4294966400  ;;  %p19_p3 = scmp.ge.s32.totalorder %s700_s18, 6   ;;  %s900_s12 = smov %s636_s13 }
  0xaa   : > { %s901_s13 = smov %s640_s14  ;;  %s902_s14 = smov %s712_s21 }
  0xab   : > { %s903_s15 = smov %s700_s18  ;;  %21 = sbr.rel (!%p19_p3) target bundleno = 7 (0x7), region = 93 }
  0xb2   :  { %363 = vsyncpa [#allocation3], 1 }
  0xb3   :  { %365 = vsyncpa [#allocation3 + $0x1], 1 }
  0xb4   :  { %366 = vsyncpa [#allocation6], 1 }
  0xb5   :  { %368 = vsyncpa [#allocation6 + $0x1], 1 }
  0xb6   :  { %369 = vsyncpa [#allocation4], 1 }
  0xb7   :  { %371 = vsyncpa [#allocation4 + $0x1], 1 }

</bundles_post_ra>
